<compile_context>
chip_gen: v6e
topology: v6e:2x2x1
jax: 0.10.0
libtpu: 0.0.40
codegen_flags: <defaults>
</compile_context>

<pallas_src>
import functools

import jax
import jax.numpy as jnp
from jax.experimental import pallas as pl
from jax.experimental.pallas import tpu as pltpu

_SUBLANE = 8
_LANE = 128
_OUT_LANES = 128  # lane-dense output block


def _round_up(a, b):
    return (a + b - 1) // b * b


def _masked_dice_kernel(ignore_value, x_ref, t_ref, out_ref,
                        acc_xt, acc_x, acc_t, acc_ign):
    j = pl.program_id(1)
    nj = pl.num_programs(1)

    # Reset per-sample partial accumulators at the start of each sample block.
    @pl.when(j == 0)
    def _():
        acc_xt[...] = jnp.zeros_like(acc_xt)
        acc_x[...] = jnp.zeros_like(acc_x)
        acc_t[...] = jnp.zeros_like(acc_t)
        acc_ign[...] = jnp.zeros_like(acc_ign)

    x = x_ref[...]                       # (Bn, Bf) f32, already cast in wrapper
    t = t_ref[...]
    ign = (t == ignore_value).astype(jnp.float32)

    # Single pass over the tile: fused ignore-count + the three sums.
    acc_xt[...] += jnp.sum(x * t, axis=-1, keepdims=True)
    acc_x[...] += jnp.sum(x, axis=-1, keepdims=True)
    acc_t[...] += jnp.sum(t, axis=-1, keepdims=True)
    acc_ign[...] += jnp.sum(ign, axis=-1, keepdims=True)

    # Only on the sample block's LAST feature tile: apply the per-sample
    # `valid` gate and emit gated per-sample sums (lanes 0/1/2 = xt, x, t).
    @pl.when(j == nj - 1)
    def _():
        bn = acc_xt.shape[0]
        valid = (acc_ign[...] == 0.0).astype(jnp.float32)          # (Bn, 1)
        lane = jax.lax.broadcasted_iota(jnp.int32, (bn, _OUT_LANES), 1)
        packed = jnp.where(lane == 0, acc_xt[...],
                 jnp.where(lane == 1, acc_x[...],
                 jnp.where(lane == 2, acc_t[...], 0.0)))
        out_ref[0] = packed * valid


def masked_dice_loss(inp, target, ignore_value=-100.0, eps=1e-4,
                     max_tile_bytes=2 * 1024 * 1024):
    """inp, target: (N, C, H, W) arrays. Returns scalar -dice (f32)."""
    N, C, H, W = inp.shape
    assert target.shape == inp.shape
    F = C * H * W

    # Lane-dense flat view; free reshape for contiguous NCHW.
    x = inp.reshape(N, F).astype(jnp.float32)
    t = target.reshape(N, F).astype(jnp.float32)

    # --- tile-size selection -------------------------------------------------
    # Samples per tile: multiple of 8 sublanes, capped.
    Bn = min(_round_up(N, _SUBLANE), 64)
    # Feature tile: multiple of 128 lanes, sized so one input tile is at most
    # `max_tile_bytes` (2 inputs x 2 pipeline buffers => 4x that live in VMEM,
    # which stays far below the 32 MiB scoped default on every generation).
    max_tile_elems = max(max_tile_bytes // 4, Bn * _LANE)
    Bf_cap = max(_LANE, (max_tile_elems // Bn) // _LANE * _LANE)
    Bf = min(_round_up(F, _LANE), Bf_cap)

    N_pad = _round_up(N, Bn)
    F_pad = _round_up(F, Bf)
    if (N_pad, F_pad) != (N, F):
        # Zero padding is neutral: contributes 0 to every sum and (with the
        # default ignore_value != 0) never matches the ignore value, so padded
        # rows/columns have no effect on the result.
        x = jnp.pad(x, ((0, N_pad - N), (0, F_pad - F)))
        t = jnp.pad(t, ((0, N_pad - N), (0, F_pad - F)))

    Ni = N_pad // Bn
    Nj = F_pad // Bf

    kernel = functools.partial(_masked_dice_kernel, float(ignore_value))

    partials = pl.pallas_call(
        kernel,
        out_shape=jax.ShapeDtypeStruct((Ni, Bn, _OUT_LANES), jnp.float32),
        grid_spec=pltpu.PrefetchScalarGridSpec(
            num_scalar_prefetch=0,
            grid=(Ni, Nj),
            in_specs=[
                pl.BlockSpec((Bn, Bf), lambda i, j: (i, j)),
                pl.BlockSpec((Bn, Bf), lambda i, j: (i, j)),
            ],
            out_specs=pl.BlockSpec((1, Bn, _OUT_LANES), lambda i, j: (i, 0, 0)),
            scratch_shapes=[pltpu.VMEM((Bn, 1), jnp.float32)] * 4,
        ),
        compiler_params=pltpu.CompilerParams(
            dimension_semantics=("parallel", "arbitrary"),
        ),
    )(x, t)

    # Tiny final reduction + dice formula (O(Ni*Bn) elements).
    intersection = jnp.sum(partials[..., 0])
    union = jnp.sum(partials[..., 1]) + jnp.sum(partials[..., 2])
    dice = (2.0 * intersection + eps) / (union + eps)
    return -dice


def _reference(inp, target, ignore_value=-100.0, eps=1e-4):
    # Pure-JAX reference mirroring the PyTorch forward (C == 1 assumed).
    n_ignored = jnp.sum(
        (target == ignore_value).astype(jnp.float32), axis=(1, 2, 3))
    valid = (n_ignored == 0.0).astype(jnp.float32)      # (N,)
    x = inp.astype(jnp.float32)
    t = target.astype(jnp.float32)
    inter = jnp.sum(valid * jnp.sum(x * t, axis=(1, 2, 3)))
    union = (jnp.sum(valid * jnp.sum(x, axis=(1, 2, 3)))
             + jnp.sum(valid * jnp.sum(t, axis=(1, 2, 3))))
    dice = (2.0 * inter + eps) / (union + eps)
    return -dice


if __name__ == "__main__":
    key = jax.random.PRNGKey(0)

    # --- Case 1: single-tile path (grid = (1, 1)) ---------------------------
    k1, k2, k3, k4 = jax.random.split(key, 4)
    N, C, H, W = 4, 1, 16, 16           # module's .squeeze() implies C == 1
    inp = jax.random.uniform(k1, (N, C, H, W), dtype=jnp.float32)
    target = (jax.random.uniform(k2, (N, C, H, W), dtype=jnp.float32) > 0.5
              ).astype(jnp.float32)
    # Samples 1 and 3 contain ignored pixels -> dropped from the loss.
    target = target.at[1, 0, 3, 5].set(-100.0)
    target = target.at[3, 0, 0, 0].set(-100.0)

    loss = masked_dice_loss(inp, target, ignore_value=-100.0)
    loss = jax.block_until_ready(loss)
    ref = _reference(inp, target, ignore_value=-100.0)
    assert jnp.allclose(loss, ref, rtol=1e-5, atol=1e-6), (loss, ref)

    # --- Case 2: multi-feature-tile reduction + N/F padding -----------------
    N2, C2, H2, W2 = 5, 1, 16, 24
    inp2 = jax.random.uniform(k3, (N2, C2, H2, W2), dtype=jnp.float32)
    target2 = (jax.random.uniform(k4, (N2, C2, H2, W2), dtype=jnp.float32) > 0.5
               ).astype(jnp.float32)
    target2 = target2.at[0, 0, 2, 3].set(-100.0)
    target2 = target2.at[4, 0, 13, 20].set(-100.0)

    # Tiny tile cap forces Bf = 128 -> 3 feature tiles per sample block,
    # exercising the cross-tile partial accumulation and the valid gate.
    loss2 = masked_dice_loss(inp2, target2, ignore_value=-100.0,
                             max_tile_bytes=4096)
    loss2 = jax.block_until_ready(loss2)
    ref2 = _reference(inp2, target2, ignore_value=-100.0)
    assert jnp.allclose(loss2, ref2, rtol=1e-5, atol=1e-6), (loss2, ref2)

    print("KERNEL_OK")
</pallas_src>

<mosaic_0001>
module attributes {stable_mosaic.version = 11 : i64} {
  func.func @_masked_dice_kernel(%arg0: i32, %arg1: i32, %arg2: memref<8x256xf32, #tpu.memory_space<vmem>>, %arg3: memref<8x256xf32, #tpu.memory_space<vmem>>, %arg4: memref<1x8x128xf32, #tpu.memory_space<vmem>>, %arg5: memref<8x1xf32, #tpu.memory_space<vmem>>, %arg6: memref<8x1xf32, #tpu.memory_space<vmem>>, %arg7: memref<8x1xf32, #tpu.memory_space<vmem>>, %arg8: memref<8x1xf32, #tpu.memory_space<vmem>>) attributes {dimension_semantics = [#tpu.dimension_semantics<parallel>, #tpu.dimension_semantics<arbitrary>], iteration_bounds = array<i64: 1, 1>, scalar_prefetch = 0 : i64, scratch_operands = 4 : i64, tpu.core_type = #tpu.core_type<tc>, window_params = [{transform_indices = @transform_0, window_bounds = array<i64: 8, 256>}, {transform_indices = @transform_1, window_bounds = array<i64: 8, 256>}, {transform_indices = @transform_2, window_bounds = array<i64: 1, 8, 128>}]} {
    %c0_i32 = arith.constant 0 : i32
    %0 = arith.cmpi eq, %arg1, %c0_i32 : i32
    %1 = arith.extui %0 : i1 to i32
    %c0_i32_0 = arith.constant 0 : i32
    %2 = arith.cmpi ne, %1, %c0_i32_0 : i32
    scf.if %2 {
      %cst_26 = arith.constant 0.000000e+00 : f32
      %33 = vector.broadcast %cst_26 : f32 to vector<8x1xf32>
      %c0_27 = arith.constant 0 : index
      %c0_28 = arith.constant 0 : index
      %34 = vector.load %arg5[%c0_27, %c0_28] : memref<8x1xf32, #tpu.memory_space<vmem>>, vector<8x1xf32>
      tpu.vector_store %arg5[%c0_27, %c0_28], %33 {strides = array<i32>} : memref<8x1xf32, #tpu.memory_space<vmem>>, vector<8x1xf32>,
      %cst_29 = arith.constant 0.000000e+00 : f32
      %35 = vector.broadcast %cst_29 : f32 to vector<8x1xf32>
      %c0_30 = arith.constant 0 : index
      %c0_31 = arith.constant 0 : index
      %36 = vector.load %arg6[%c0_30, %c0_31] : memref<8x1xf32, #tpu.memory_space<vmem>>, vector<8x1xf32>
      tpu.vector_store %arg6[%c0_30, %c0_31], %35 {strides = array<i32>} : memref<8x1xf32, #tpu.memory_space<vmem>>, vector<8x1xf32>,
      %cst_32 = arith.constant 0.000000e+00 : f32
      %37 = vector.broadcast %cst_32 : f32 to vector<8x1xf32>
      %c0_33 = arith.constant 0 : index
      %c0_34 = arith.constant 0 : index
      %38 = vector.load %arg7[%c0_33, %c0_34] : memref<8x1xf32, #tpu.memory_space<vmem>>, vector<8x1xf32>
      tpu.vector_store %arg7[%c0_33, %c0_34], %37 {strides = array<i32>} : memref<8x1xf32, #tpu.memory_space<vmem>>, vector<8x1xf32>,
      %cst_35 = arith.constant 0.000000e+00 : f32
      %39 = vector.broadcast %cst_35 : f32 to vector<8x1xf32>
      %c0_36 = arith.constant 0 : index
      %c0_37 = arith.constant 0 : index
      %40 = vector.load %arg8[%c0_36, %c0_37] : memref<8x1xf32, #tpu.memory_space<vmem>>, vector<8x1xf32>
      tpu.vector_store %arg8[%c0_36, %c0_37], %39 {strides = array<i32>} : memref<8x1xf32, #tpu.memory_space<vmem>>, vector<8x1xf32>,
    } else {
    }
    %c0 = arith.constant 0 : index
    %c0_1 = arith.constant 0 : index
    %3 = vector.load %arg2[%c0, %c0_1] : memref<8x256xf32, #tpu.memory_space<vmem>>, vector<8x256xf32>
    %c0_2 = arith.constant 0 : index
    %c0_3 = arith.constant 0 : index
    %4 = vector.load %arg3[%c0_2, %c0_3] : memref<8x256xf32, #tpu.memory_space<vmem>>, vector<8x256xf32>
    %cst = arith.constant -1.000000e+02 : f32
    %5 = vector.broadcast %cst : f32 to vector<8x256xf32>
    %6 = arith.cmpf oeq, %4, %5 : vector<8x256xf32>
    %7 = arith.extui %6 : vector<8x256xi1> to vector<8x256xi32>
    %8 = arith.sitofp %7 : vector<8x256xi32> to vector<8x256xf32>
    %c0_4 = arith.constant 0 : index
    %c0_5 = arith.constant 0 : index
    %9 = vector.load %arg5[%c0_4, %c0_5] : memref<8x1xf32, #tpu.memory_space<vmem>>, vector<8x1xf32>
    %10 = arith.mulf %3, %4 : vector<8x256xf32>
    %cst_6 = arith.constant dense<0.000000e+00> : vector<8xf32>
    %11 = vector.multi_reduction <add>, %10, %cst_6 [1] : vector<8x256xf32> to vector<8xf32>
    %12 = vector.shape_cast %11 : vector<8xf32> to vector<8x1xf32>
    %13 = arith.addf %9, %12 : vector<8x1xf32>
    %c0_7 = arith.constant 0 : index
    %c0_8 = arith.constant 0 : index
    %14 = vector.load %arg5[%c0_7, %c0_8] : memref<8x1xf32, #tpu.memory_space<vmem>>, vector<8x1xf32>
    tpu.vector_store %arg5[%c0_7, %c0_8], %13 {strides = array<i32>} : memref<8x1xf32, #tpu.memory_space<vmem>>, vector<8x1xf32>,
    %c0_9 = arith.constant 0 : index
    %c0_10 = arith.constant 0 : index
    %15 = vector.load %arg6[%c0_9, %c0_10] : memref<8x1xf32, #tpu.memory_space<vmem>>, vector<8x1xf32>
    %cst_11 = arith.constant dense<0.000000e+00> : vector<8xf32>
    %16 = vector.multi_reduction <add>, %3, %cst_11 [1] : vector<8x256xf32> to vector<8xf32>
    %17 = vector.shape_cast %16 : vector<8xf32> to vector<8x1xf32>
    %18 = arith.addf %15, %17 : vector<8x1xf32>
    %c0_12 = arith.constant 0 : index
    %c0_13 = arith.constant 0 : index
    %19 = vector.load %arg6[%c0_12, %c0_13] : memref<8x1xf32, #tpu.memory_space<vmem>>, vector<8x1xf32>
    tpu.vector_store %arg6[%c0_12, %c0_13], %18 {strides = array<i32>} : memref<8x1xf32, #tpu.memory_space<vmem>>, vector<8x1xf32>,
    %c0_14 = arith.constant 0 : index
    %c0_15 = arith.constant 0 : index
    %20 = vector.load %arg7[%c0_14, %c0_15] : memref<8x1xf32, #tpu.memory_space<vmem>>, vector<8x1xf32>
    %cst_16 = arith.constant dense<0.000000e+00> : vector<8xf32>
    %21 = vector.multi_reduction <add>, %4, %cst_16 [1] : vector<8x256xf32> to vector<8xf32>
    %22 = vector.shape_cast %21 : vector<8xf32> to vector<8x1xf32>
    %23 = arith.addf %20, %22 : vector<8x1xf32>
    %c0_17 = arith.constant 0 : index
    %c0_18 = arith.constant 0 : index
    %24 = vector.load %arg7[%c0_17, %c0_18] : memref<8x1xf32, #tpu.memory_space<vmem>>, vector<8x1xf32>
    tpu.vector_store %arg7[%c0_17, %c0_18], %23 {strides = array<i32>} : memref<8x1xf32, #tpu.memory_space<vmem>>, vector<8x1xf32>,
    %c0_19 = arith.constant 0 : index
    %c0_20 = arith.constant 0 : index
    %25 = vector.load %arg8[%c0_19, %c0_20] : memref<8x1xf32, #tpu.memory_space<vmem>>, vector<8x1xf32>
    %cst_21 = arith.constant dense<0.000000e+00> : vector<8xf32>
    %26 = vector.multi_reduction <add>, %8, %cst_21 [1] : vector<8x256xf32> to vector<8xf32>
    %27 = vector.shape_cast %26 : vector<8xf32> to vector<8x1xf32>
    %28 = arith.addf %25, %27 : vector<8x1xf32>
    %c0_22 = arith.constant 0 : index
    %c0_23 = arith.constant 0 : index
    %29 = vector.load %arg8[%c0_22, %c0_23] : memref<8x1xf32, #tpu.memory_space<vmem>>, vector<8x1xf32>
    tpu.vector_store %arg8[%c0_22, %c0_23], %28 {strides = array<i32>} : memref<8x1xf32, #tpu.memory_space<vmem>>, vector<8x1xf32>,
    %c0_i32_24 = arith.constant 0 : i32
    %30 = arith.cmpi eq, %arg1, %c0_i32_24 : i32
    %31 = arith.extui %30 : i1 to i32
    %c0_i32_25 = arith.constant 0 : i32
    %32 = arith.cmpi ne, %31, %c0_i32_25 : i32
    scf.if %32 {
      %c0_26 = arith.constant 0 : index
      %c0_27 = arith.constant 0 : index
      %33 = vector.load %arg8[%c0_26, %c0_27] : memref<8x1xf32, #tpu.memory_space<vmem>>, vector<8x1xf32>
      %cst_28 = arith.constant 0.000000e+00 : f32
      %34 = vector.broadcast %cst_28 : f32 to vector<8x1xf32>
      %35 = arith.cmpf oeq, %33, %34 : vector<8x1xf32>
      %36 = arith.extui %35 : vector<8x1xi1> to vector<8x1xi32>
      %37 = arith.sitofp %36 : vector<8x1xi32> to vector<8x1xf32>
      %38 = tpu.iota {dimensions = array<i32: 1>} : vector<8x128xi32>
      %c0_i32_29 = arith.constant 0 : i32
      %39 = vector.broadcast %c0_i32_29 : i32 to vector<8x128xi32>
      %40 = arith.cmpi eq, %38, %39 : vector<8x128xi32>
      %c0_30 = arith.constant 0 : index
      %c0_31 = arith.constant 0 : index
      %41 = vector.load %arg5[%c0_30, %c0_31] : memref<8x1xf32, #tpu.memory_space<vmem>>, vector<8x1xf32>
      %c1_i32 = arith.constant 1 : i32
      %42 = vector.broadcast %c1_i32 : i32 to vector<8x128xi32>
      %43 = arith.cmpi eq, %38, %42 : vector<8x128xi32>
      %c0_32 = arith.constant 0 : index
      %c0_33 = arith.constant 0 : index
      %44 = vector.load %arg6[%c0_32, %c0_33] : memref<8x1xf32, #tpu.memory_space<vmem>>, vector<8x1xf32>
      %c2_i32 = arith.constant 2 : i32
      %45 = vector.broadcast %c2_i32 : i32 to vector<8x128xi32>
      %46 = arith.cmpi eq, %38, %45 : vector<8x128xi32>
      %c0_34 = arith.constant 0 : index
      %c0_35 = arith.constant 0 : index
      %47 = vector.load %arg7[%c0_34, %c0_35] : memref<8x1xf32, #tpu.memory_space<vmem>>, vector<8x1xf32>
      %cst_36 = arith.constant 0.000000e+00 : f32
      %48 = vector.shape_cast %47 : vector<8x1xf32> to vector<8x1xf32>
      %49 = vector.broadcast %48 : vector<8x1xf32> to vector<8x128xf32>
      %50 = vector.broadcast %cst_36 : f32 to vector<8x128xf32>
      %51 = arith.select %46, %49, %50 : vector<8x128xi1>, vector<8x128xf32>
      %52 = vector.shape_cast %44 : vector<8x1xf32> to vector<8x1xf32>
      %53 = vector.broadcast %52 : vector<8x1xf32> to vector<8x128xf32>
      %54 = arith.select %43, %53, %51 : vector<8x128xi1>, vector<8x128xf32>
      %55 = vector.shape_cast %41 : vector<8x1xf32> to vector<8x1xf32>
      %56 = vector.broadcast %55 : vector<8x1xf32> to vector<8x128xf32>
      %57 = arith.select %40, %56, %54 : vector<8x128xi1>, vector<8x128xf32>
      %58 = vector.broadcast %37 : vector<8x1xf32> to vector<8x128xf32>
      %59 = arith.mulf %57, %58 : vector<8x128xf32>
      %c0_37 = arith.constant 0 : index
      %c0_38 = arith.constant 0 : index
      %c0_39 = arith.constant 0 : index
      %60 = vector.load %arg4[%c0_37, %c0_38, %c0_39] : memref<1x8x128xf32, #tpu.memory_space<vmem>>, vector<1x8x128xf32>
      %61 = vector.shape_cast %60 : vector<1x8x128xf32> to vector<8x128xf32>
      %62 = vector.shape_cast %59 : vector<8x128xf32> to vector<1x8x128xf32>
      tpu.vector_store %arg4[%c0_37, %c0_38, %c0_39], %62 {strides = array<i32>} : memref<1x8x128xf32, #tpu.memory_space<vmem>>, vector<1x8x128xf32>,
    } else {
    }
    return
  }
  func.func @transform_0(%arg0: i32, %arg1: i32) -> (i32, i32) {
    %c0_i32 = arith.constant 0 : i32
    return %arg0, %arg1 : i32, i32
  }
  func.func @transform_1(%arg0: i32, %arg1: i32) -> (i32, i32) {
    %c0_i32 = arith.constant 0 : i32
    return %arg0, %arg1 : i32, i32
  }
  func.func @transform_2(%arg0: i32, %arg1: i32) -> (i32, i32, i32) {
    %c0_i32 = arith.constant 0 : i32
    %c0_i32_0 = arith.constant 0 : i32
    %c0_i32_1 = arith.constant 0 : i32
    return %arg0, %c0_i32, %c0_i32_0 : i32, i32, i32
  }
}

</mosaic_0001>

<bundles_post_ra>
// kernel: tpu_custom_call.1
= control target key start
LH: loop header
LB: loop body
LE: loop exit
PB: predicated region body
PF: predicated region fallthrough
CT: control target
= control target key end

     0   :  { %7 = vsyncpa [#allocation7], 0  ;;  %s251_s0 = inlined_call_operand.hbm [shape: f32[8,256], index: 0, kind: input, shape index: {}]   ;;  %s252_s1 = inlined_call_operand.hbm [shape: f32[8,256], index: 1, kind: input, shape index: {}]   ;;  %s253_s2 = inlined_call_operand.hbm [shape: f32[1,8,128], index: 2, kind: output, shape index: {}]  }
   0x1   :  { %8 = vsyncpa [#allocation10], 0 }
   0x2   :  { %9 = vsyncpa [#allocation8], 0  ;;  %s214_s9 = smov [#allocation6]   ;;  %s215_s11 = smov [#allocation9]  }
   0x3   :  { %s16_s10 = sshll.u32 %s214_s9, 4  ;;  %s26_s12 = sshll.u32 %s215_s11, 4  ;;  %s17_s10 = int_to_ptr.vmem [resolvable:$true] %s16_s10  ;;  %s27_s12 = int_to_ptr.vmem [resolvable:$true] %s26_s12 }
   0x4   :  { %s156_s13 = scalar_lea.vmem %s17_s10, 256  ;;  %p161_p1 = scmp.lt.s32.totalorder %s17_s10, %s17_s10 }
   0x5   :  { %p157_p0 = scmp.ne.s32.totalorder %s17_s10, %s156_s13  ;;  %p162_p2 = scmp.lt.s32.totalorder %s156_s13, %s156_s13 }
   0x7   :  { %p163_p3 = por %p162_p2, %p161_p1 }
   0x9   :  { %p164_p4 = pnand %p163_p3, %p157_p0 }
   0xb   :  { %167 = shalt.err (!%p164_p4)
}
   0xc   :  { %19 = dma.hbm_to_vmem [thread:$0]  %s251_s0, 256, %s17_s10, [#allocation7]  }
   0xd   :  { %s176_s16 = scalar_lea.vmem %s27_s12, 256  ;;  %p181_p6 = scmp.lt.s32.totalorder %s27_s12, %s27_s12 }
   0xe   :  { %p177_p5 = scmp.ne.s32.totalorder %s27_s12, %s176_s16  ;;  %p182_p7 = scmp.lt.s32.totalorder %s176_s16, %s176_s16 }
  0x10   :  { %p183_p8 = por %p182_p7, %p181_p6 }
  0x12   :  { %p184_p9 = pnand %p183_p8, %p177_p5 }
  0x14   :  { %187 = shalt.err (!%p184_p9)
}
  0x15   :  { %29 = dma.hbm_to_vmem [thread:$0]  %s252_s1, 256, %s27_s12, [#allocation10]  }
  0x16   :  { %208 = dma.done.wait [#allocation7], 256  }
  0x17   :  { %209 = vsyncadd [#allocation7], 4294967040 }
  0x18   :  { %210 = dma.done.wait [#allocation10], 256  }
  0x19   :  { %211 = vsyncadd [#allocation10], 4294967040  ;;  %vm40_vm0 = vcmask 7168   ;;  %v216_v0 = vmov 0.0   ;;  %v47_v1 = vld [vmem:[#allocation9] sm:$0xff]  ;;  %v48_v2 = vld [vmem:[#allocation9 + $0x8] sm:$0xff]  ;;  %v89_v31 = vlaneseq }
  0x1a   :  { %43 = vst.msk [vmem:[#allocation4] sm:$0xff] %vm40_vm0, %v216_v0  ;;  %41 = vst.msk [vmem:[#allocation2] sm:$0xff] %vm40_vm0, %v216_v0  ;;  %v45_v3 = vld [vmem:[#allocation6] sm:$0xff]  ;;  %v71_v4 = vadd.f32 %v48_v2, %v47_v1  ;;  %vm49_vm1 = vcmp.eq.f32.partialorder %v47_v1, -100.0  ;;  %vm50_vm2 = vcmp.eq.f32.partialorder %v48_v2, -100.0  ;;  %v46_v5 = vld [vmem:[#allocation6 + $0x8] sm:$0xff] }
  0x1b   :  { %42 = vst.msk [vmem:[#allocation3] sm:$0xff] %vm40_vm0, %v216_v0  ;;  %44 = vst.msk [vmem:[#allocation5] sm:$0xff] %vm40_vm0, %v216_v0  ;;  %v56_v6 = vmul.f32 %v47_v1, %v45_v3  ;;  %v138_v7 = vsel %vm49_vm1, 1.0, %v216_v0  ;;  %v139_v8 = vsel %vm50_vm2, 1.0, %v216_v0  ;;  %v57_v9 = vmul.f32 %v48_v2, %v46_v5  ;;  %s218_s0 = smov [#allocation11]  }
  0x1c   :  { %72 = vadd.xlane.f32.xlu0 %v71_v4  ;;  %v77_v10 = vadd.f32 %v139_v8, %v138_v7  ;;  %v65_v11 = vadd.f32 %v46_v5, %v45_v3  ;;  %v217_v13 = vmov 0   ;;  %v90_v32 = vand.u32 127, %v89_v31  ;;  %s128_s1 = sshll.u32 %s218_s0, 4  ;;  %s129_s1 = int_to_ptr.vmem [resolvable:$true] %s128_s1 }
  0x1d   :  { %v58_v12 = vadd.f32 %v57_v9, %v56_v6  ;;  %146 = vset.pattern.permute.xlu0 %v217_v13  ;;  %147 = vset.pattern.permute.xlu1 %v217_v13  ;;  %s188_s19 = scalar_lea.vmem %s129_s1, 128  ;;  %p193_p11 = scmp.lt.s32.totalorder %s129_s1, %s129_s1 }
  0x1e   :  { %78 = vadd.xlane.f32.xlu1 %v77_v10  ;;  %vm95_vm4 = vcmp.eq.s32.totalorder %v90_v32, 2  ;;  %vm93_vm5 = vcmp.eq.s32.totalorder %v90_v32, 1  ;;  %vm91_vm6 = vcmp.eq.s32.totalorder %v90_v32, 0  ;;  %p189_p10 = scmp.ne.s32.totalorder %s129_s1, %s188_s19  ;;  %p194_p12 = scmp.lt.s32.totalorder %s188_s19, %s188_s19 }
  0x20   :  { %66 = vadd.xlane.f32.xlu0 %v65_v11  ;;  %p195_p13 = por %p194_p12, %p193_p11 }
  0x21   :  { %v70_v14 = vld [vmem:[#allocation4] sm:$0xff]  ;;  %v55_v22 = vld [vmem:[#allocation2] sm:$0xff] }
  0x22   :  { %59 = vadd.xlane.f32.xlu1 %v58_v12  ;;  %v76_v16 = vld [vmem:[#allocation5] sm:$0xff]  ;;  %v64_v19 = vld [vmem:[#allocation3] sm:$0xff]  ;;  %p196_p0 = pnand %p195_p13, %p189_p10 }
  0xa5   :  { %v73_v15 = vpop.xlane.xlu0 %72 }
  0xa6   :  { %v74_v17 = vadd.f32 %v73_v15, %v70_v14 }
  0xa7   :  { %v79_v18 = vpop.xlane.xlu1 %78 }
  0xa8   :  { %75 = vst.msk [vmem:[#allocation4] sm:$0xff] %vm40_vm0, %v74_v17  ;;  %v80_v20 = vadd.f32 %v79_v18, %v76_v16 }
  0xa9   :  { %v67_v21 = vpop.xlane.xlu0 %66 }
  0xaa   :  { %81 = vst.msk [vmem:[#allocation5] sm:$0xff] %vm40_vm0, %v80_v20  ;;  %v68_v23 = vadd.f32 %v67_v21, %v64_v19 }
  0xab   :  { %v60_v24 = vpop.xlane.xlu1 %59 }
  0xac   :  { %69 = vst.msk [vmem:[#allocation3] sm:$0xff] %vm40_vm0, %v68_v23  ;;  %v61_v25 = vadd.f32 %v60_v24, %v55_v22 }
  0xae   :  { %63 = vst.msk [vmem:[#allocation2] sm:$0xff] %vm40_vm0, %v61_v25 }
  0xaf   :  { %v96_v26 = vld [vmem:[#allocation4] sm:$0xff] }
  0xb0   :  { %99 = vperm.xlu0 %146, %v96_v26  }
  0xb1   :  { %v85_v29 = vld [vmem:[#allocation5] sm:$0xff] }
  0xb2   :  { %vm86_vm3 = vcmp.eq.f32.partialorder %v85_v29, 0.0 }
  0xb3   :  { %v94_v27 = vld [vmem:[#allocation3] sm:$0xff]  ;;  %v140_v30 = vsel %vm86_vm3, 1.0, %v216_v0 }
  0xb4   :  { %105 = vperm.xlu1 %147, %v94_v27  }
  0xb5   :  { %v92_v28 = vld [vmem:[#allocation2] sm:$0xff] }
  0xb8   :  { %111 = vperm.xlu1 %147, %v92_v28  }
  0xbc   :  { %117 = vperm.xlu1 %147, %v140_v30  }
 0x12b   :  { %v100_v34 = vpop.permute.xlu0 %99 }
 0x12c   :  { %v102_v36 = vsel %vm95_vm4, %v100_v34, 0.0 }
 0x12f   :  { %v106_v33 = vpop.permute.xlu1 %105 }
 0x130   :  { %v108_v37 = vsel %vm93_vm5, %v106_v33, %v102_v36 }
 0x133   :  { %v112_v35 = vpop.permute.xlu1 %111 }
 0x134   :  { %v114_v38 = vsel %vm91_vm6, %v112_v35, %v108_v37 }
 0x137   :  { %v118_v39 = vpop.permute.xlu1 %117 }
 0x138   :  { %v120_v40 = vmul.f32 %v118_v39, %v114_v38 }
 0x13a   :  { %121 = vst [vmem:[#allocation11] sm:$0xff] %v120_v40 }
 0x13b   :  { %199 = shalt.err (!%p196_p0)
}
 0x13c   :  { %131 = dma.vmem_to_hbm [thread:$0]  %s129_s1, 128, %s253_s2, [#allocation8]  }
 0x13d   :  { %212 = dma.done.wait [#allocation8], 128  }
 0x13e   :  { %213 = vsyncadd [#allocation8], 4294967168 }
 0x13f   :  { %135 = vsyncpa [#allocation7], 1 }
 0x140   :  { %136 = vsyncpa [#allocation10], 1 }
 0x141   :  { %137 = vsyncpa [#allocation8], 1 }

</bundles_post_ra>
